<compile_context>
chip_gen: v7x
topology: tpu7x:2x2x1
jax: 0.10.0
libtpu: 0.0.40
codegen_flags: <defaults>
</compile_context>

<pallas_src>
import functools
import math

import jax
import jax.numpy as jnp
from jax.experimental import pallas as pl
from jax.experimental.pallas import tpu as pltpu

EPS = 1e-12                        # F.normalize default eps
_VMEM_TARGET = 24 * 1024 * 1024    # auto-tiling working-set budget
_VMEM_LIMIT = 40 * 1024 * 1024     # scoped VMEM limit handed to Mosaic
                                   # (safe on v5e/v6e [128 MiB phys] and
                                   #  leaves headroom on v7x [64 MiB phys])


def _round_up(v, m):
    return ((v + m - 1) // m) * m


def _divisor_tile(total, granule, cap):
    """Largest multiple of `granule` that divides `total` and is <= cap.
    `total` must itself be a multiple of `granule`."""
    cap = max(granule, min(cap, total))
    t = (cap // granule) * granule
    while total % t:
        t -= granule
    return t


def _vmem_estimate(bm, bn, D, dot_bytes, out_bytes):
    w = 2 * D * bn * dot_bytes            # weight block, double-buffered
    x = 2 * bm * D * dot_bytes            # x block, double-buffered
    stats = 2 * bm * 128 * 4              # (bm, 8) stats, lane-padded
    outs = 2 * 2 * bm * bn * out_bytes    # two outputs, double-buffered
    norm_tmp = D * bn * 4                 # f32 temp for in-kernel column norm
    return w + x + stats + outs + norm_tmp + 8 * bn * 4


def _maglinear_kernel(x_ref, w_ref, stats_ref, cos_ref, cosm_ref, inv_wn_ref,
                      *, scale, easy_margin):
    i = pl.program_id(1)   # fast axis = B tiles; weight block is resident

    # Weight column norms: computed once per N-tile (first B step) into a
    # (1, bn) VMEM scratch and reused for the remaining B tiles.  Removes the
    # wrapper's separate O(D*N) HBM pass over the weight.
    @pl.when(i == 0)
    def _():
        wf = w_ref[...].astype(jnp.float32)
        col = jnp.sqrt(jnp.sum(wf * wf, axis=0, keepdims=True))
        inv_wn_ref[...] = 1.0 / jnp.maximum(col, EPS)

    # Raw inner products on the MXU (bf16 inputs by default, f32 accumulate).
    raw = jnp.dot(x_ref[...], w_ref[...], preferred_element_type=jnp.float32)

    stats = stats_ref[...]            # (bm, 8) fused per-row statistics
    inv_xn = stats[:, 0:1]            # 1 / ||x_row||
    s_cos_m = stats[:, 1:2]           # scale * cos(margin)
    s_sin_m = stats[:, 2:3]           # scale * sin(margin)

    # Post-matmul rescale by precomputed inverse norms (implicit broadcast).
    cos_theta = jnp.clip(raw * inv_xn * inv_wn_ref[...], -1.0, 1.0)
    sin_theta = jnp.sqrt(1.0 - cos_theta * cos_theta)       # EUP

    out_cos = scale * cos_theta
    ctm = cos_theta * s_cos_m - sin_theta * s_sin_m          # already scaled
    if easy_margin:
        out_ctm = jnp.where(cos_theta > 0.0, ctm, out_cos)
    else:
        thr = stats[:, 3:4]           # cos(pi - margin)
        s_mm = stats[:, 4:5]          # scale * sin(pi - margin) * margin
        out_ctm = jnp.where(cos_theta > thr, ctm, out_cos - s_mm)

    cos_ref[...] = out_cos.astype(cos_ref.dtype)
    cosm_ref[...] = out_ctm.astype(cosm_ref.dtype)


def maglinear_forward(x, weight, *, scale=64.0, easy_margin=True,
                      l_margin=0.45, u_margin=0.8, l_a=10.0, u_a=110.0,
                      block_b=None, block_n=None,
                      matmul_dtype=jnp.bfloat16, out_dtype=None):
    """Forward pass of the PyTorch MagLinear module as a Pallas TPU kernel.

    matmul_dtype: dtype of the MXU inputs (default bf16; accumulation is
      always f32).  Pass jnp.float32 for an exactness mode.
    out_dtype: dtype of the two (B, N) outputs (default: x.dtype).
    """
    x = jnp.asarray(x)
    weight = jnp.asarray(weight)
    B, D = x.shape
    Dw, N = weight.shape
    if D != Dw:
        raise ValueError(f"in_features mismatch: {D} vs {Dw}")

    dot_dtype = jnp.dtype(matmul_dtype)
    out_dtype = jnp.dtype(x.dtype if out_dtype is None else out_dtype)

    # ---- Per-row statistics (O(B*D)): plain JAX, invariant across N-tiles.
    xf = x.astype(jnp.float32)
    xn = jnp.sqrt(jnp.sum(xf * xf, axis=1, keepdims=True))          # (B,1)
    x_norm = jnp.clip(xn, l_a, u_a)
    ada = (u_margin - l_margin) / (u_a - l_a) * (x_norm - l_a) + l_margin
    inv_xn = 1.0 / jnp.maximum(xn, EPS)
    s_cos_m = scale * jnp.cos(ada)
    s_sin_m = scale * jnp.sin(ada)
    if easy_margin:
        thr = jnp.zeros_like(xn)
        s_mm = jnp.zeros_like(xn)
    else:
        thr = jnp.cos(math.pi - ada)
        s_mm = scale * jnp.sin(math.pi - ada) * ada
    # Fused (B, 8) side input: one DMA per B step instead of 5-7.
    stats = jnp.concatenate(
        [inv_xn, s_cos_m, s_sin_m, thr, s_mm,
         jnp.zeros((B, 3), jnp.float32)], axis=1)

    # ---- Tile selection: (8,128)-aligned, bounded by a VMEM budget.
    if block_b is not None:
        bm = _round_up(block_b, 8)
        Bp = _round_up(B, bm)
    else:
        Bp = _round_up(B, 8)
        bm = _divisor_tile(Bp, 8, 256)
    if block_n is not None:
        bn = _round_up(block_n, 128)
        Np = _round_up(N, bn)
    else:
        Np = _round_up(N, 128)
        bn = _divisor_tile(Np, 128, 2048)
        while bn > 128 and _vmem_estimate(
                bm, bn, D, dot_dtype.itemsize, out_dtype.itemsize) > _VMEM_TARGET:
            bn = _divisor_tile(Np, 128, bn - 128)
        if block_b is None:
            while bm > 8 and _vmem_estimate(
                    bm, bn, D, dot_dtype.itemsize, out_dtype.itemsize) > _VMEM_TARGET:
                bm = _divisor_tile(Bp, 8, bm - 8)
    # TODO(synk): for very large in_features (D >~ 2K on v7x's 64 MiB VMEM)
    # add a K grid axis with an f32 VMEM accumulator instead of shrinking bn.

    # ---- x / stats: O(B*D) pad + cast (cheap).
    x_mm = xf
    if Bp != B:
        x_mm = jnp.pad(x_mm, ((0, Bp - B), (0, 0)))
        stats = jnp.pad(stats, ((0, Bp - B), (0, 0)))
    x_mm = x_mm.astype(dot_dtype)

    # ---- Weight: no wrapper-side copy if already matmul-dtype + tile-aligned.
    w_mm = weight
    if Np != N:
        w_mm = jnp.pad(w_mm, ((0, 0), (0, Np - N)))
    if w_mm.dtype != dot_dtype:
        w_mm = w_mm.astype(dot_dtype)

    grid = (Np // bn, Bp // bm)   # N slow, B fast -> weight revisit-invariant

    kernel = functools.partial(_maglinear_kernel, scale=scale,
                               easy_margin=easy_margin)
    cos_t, cos_tm = pl.pallas_call(
        kernel,
        out_shape=[jax.ShapeDtypeStruct((Bp, Np), out_dtype),
                   jax.ShapeDtypeStruct((Bp, Np), out_dtype)],
        grid_spec=pltpu.PrefetchScalarGridSpec(
            num_scalar_prefetch=0,
            grid=grid,
            in_specs=[
                pl.BlockSpec((bm, D), lambda j, i: (i, 0)),   # x: streams over i
                pl.BlockSpec((D, bn), lambda j, i: (0, j)),   # w: resident in i
                pl.BlockSpec((bm, 8), lambda j, i: (i, 0)),   # fused row stats
            ],
            out_specs=[
                pl.BlockSpec((bm, bn), lambda j, i: (i, j)),
                pl.BlockSpec((bm, bn), lambda j, i: (i, j)),
            ],
            scratch_shapes=[pltpu.VMEM((1, bn), jnp.float32)],   # inv ||w_col||
        ),
        compiler_params=pltpu.CompilerParams(
            # megacore split along N so each TC streams a disjoint weight half
            dimension_semantics=("parallel", "arbitrary"),
            vmem_limit_bytes=_VMEM_LIMIT,
        ),
    )(x_mm, w_mm, stats)

    if Bp != B or Np != N:          # slice only when padding actually occurred
        cos_t = cos_t[:B, :N]
        cos_tm = cos_tm[:B, :N]
    return [cos_t, cos_tm], x_norm


def init_weight(key, in_features, out_features):
    """Replica of the PyTorch init: uniform(-1,1) -> renorm columns to 1e-5
    -> * 1e5 (each column ends up with L2 norm == 1 when original > 1e-5)."""
    w = jax.random.uniform(key, (in_features, out_features),
                           dtype=jnp.float32, minval=-1.0, maxval=1.0)
    col_norm = jnp.sqrt(jnp.sum(w * w, axis=0, keepdims=True))
    s = jnp.where(col_norm > 1e-5, 1e-5 / col_norm, 1.0)
    return w * s * 100000.0


def _reference(x, weight, *, scale=64.0, easy_margin=True, l_margin=0.45,
               u_margin=0.8, l_a=10.0, u_a=110.0):
    xn = jnp.linalg.norm(x, axis=1, keepdims=True)
    xn_c = jnp.clip(xn, l_a, u_a)
    ada = (u_margin - l_margin) / (u_a - l_a) * (xn_c - l_a) + l_margin
    cm, sm = jnp.cos(ada), jnp.sin(ada)
    w_hat = weight / jnp.maximum(
        jnp.linalg.norm(weight, axis=0, keepdims=True), EPS)
    x_hat = x / jnp.maximum(xn, EPS)
    ct = jnp.clip(x_hat @ w_hat, -1.0, 1.0)
    st = jnp.sqrt(1.0 - ct * ct)
    ctm = ct * cm - st * sm
    if easy_margin:
        ctm = jnp.where(ct > 0, ctm, ct)
    else:
        mmv = jnp.sin(math.pi - ada) * ada
        thr = jnp.cos(math.pi - ada)
        ctm = jnp.where(ct > thr, ctm, ct - mmv)
    return [scale * ct, scale * ctm], xn_c


if __name__ == "__main__":
    key = jax.random.PRNGKey(0)
    kx, kw, kx2, kw2 = jax.random.split(key, 4)

    # Case 1: easy margin, f32 exactness mode, multi-tile grid (2x2).
    B, IN_F, OUT_F = 16, 32, 256
    x = 10.0 * jax.random.normal(kx, (B, IN_F), dtype=jnp.float32)
    w = init_weight(kw, IN_F, OUT_F)

    (cos_t, cos_tm), x_norm = maglinear_forward(
        x, w, matmul_dtype=jnp.float32, block_b=8, block_n=128)
    jax.block_until_ready((cos_t, cos_tm, x_norm))

    (r_ct, r_ctm), r_xn = _reference(x, w)
    assert jnp.allclose(cos_t, r_ct, atol=1e-4)
    assert jnp.allclose(cos_tm, r_ctm, atol=1e-4)
    assert jnp.allclose(x_norm, r_xn, atol=1e-4)

    # Case 2: hard margin, default bf16 matmul, unaligned shapes (padding +
    # multi-tile grid 2x3).  Looser tolerance for bf16 input rounding.
    B2, IN2, OUT2 = 20, 48, 200
    x2 = 10.0 * jax.random.normal(kx2, (B2, IN2), dtype=jnp.float32)
    w2 = init_weight(kw2, IN2, OUT2)

    (c2, cm2), n2 = maglinear_forward(x2, w2, easy_margin=False,
                                      block_b=8, block_n=128)
    jax.block_until_ready((c2, cm2, n2))

    (rc2, rcm2), rn2 = _reference(x2, w2, easy_margin=False)
    assert jnp.allclose(c2, rc2, atol=0.35, rtol=0.01)
    assert jnp.allclose(cm2, rcm2, atol=0.35, rtol=0.01)
    assert jnp.allclose(n2, rn2, atol=1e-4)

    print("KERNEL_OK")
</pallas_src>

<mosaic_0001>
module attributes {stable_mosaic.version = 11 : i64} {
  func.func @_maglinear_kernel(%arg0: i32, %arg1: i32, %arg2: memref<8x32xf32, #tpu.memory_space<vmem>>, %arg3: memref<32x128xf32, #tpu.memory_space<vmem>>, %arg4: memref<8x8xf32, #tpu.memory_space<vmem>>, %arg5: memref<8x128xf32, #tpu.memory_space<vmem>>, %arg6: memref<8x128xf32, #tpu.memory_space<vmem>>, %arg7: memref<1x128xf32, #tpu.memory_space<vmem>>) attributes {dimension_semantics = [#tpu.dimension_semantics<parallel>, #tpu.dimension_semantics<arbitrary>], iteration_bounds = array<i64: 2, 2>, scalar_prefetch = 0 : i64, scratch_operands = 1 : i64, tpu.core_type = #tpu.core_type<tc>, window_params = [{transform_indices = @transform_0, window_bounds = array<i64: 8, 32>}, {transform_indices = @transform_1, window_bounds = array<i64: 32, 128>}, {transform_indices = @transform_2, window_bounds = array<i64: 8, 8>}, {transform_indices = @transform_3, window_bounds = array<i64: 8, 128>}, {transform_indices = @transform_4, window_bounds = array<i64: 8, 128>}]} {
    %c0_i32 = arith.constant 0 : i32
    %0 = arith.cmpi eq, %arg1, %c0_i32 : i32
    %1 = arith.extui %0 : i1 to i32
    %c0_i32_0 = arith.constant 0 : i32
    %2 = arith.cmpi ne, %1, %c0_i32_0 : i32
    scf.if %2 {
      %c0_17 = arith.constant 0 : index
      %c0_18 = arith.constant 0 : index
      %35 = vector.load %arg3[%c0_17, %c0_18] : memref<32x128xf32, #tpu.memory_space<vmem>>, vector<32x128xf32>
      %36 = arith.mulf %35, %35 : vector<32x128xf32>
      %cst_19 = arith.constant dense<0.000000e+00> : vector<128xf32>
      %37 = vector.multi_reduction <add>, %36, %cst_19 [0] : vector<32x128xf32> to vector<128xf32>
      %38 = vector.shape_cast %37 : vector<128xf32> to vector<1x128xf32>
      %39 = math.sqrt %38 : vector<1x128xf32>
      %cst_20 = arith.constant 9.99999996E-13 : f32
      %40 = vector.broadcast %cst_20 : f32 to vector<1x128xf32>
      %41 = arith.maximumf %39, %40 : vector<1x128xf32>
      %cst_21 = arith.constant 1.000000e+00 : f32
      %42 = vector.broadcast %cst_21 : f32 to vector<1x128xf32>
      %43 = arith.divf %42, %41 : vector<1x128xf32>
      %c0_22 = arith.constant 0 : index
      %c0_23 = arith.constant 0 : index
      %44 = vector.load %arg7[%c0_22, %c0_23] : memref<1x128xf32, #tpu.memory_space<vmem>>, vector<1x128xf32>
      tpu.vector_store %arg7[%c0_22, %c0_23], %43 {strides = array<i32>} : memref<1x128xf32, #tpu.memory_space<vmem>>, vector<1x128xf32>,
    } else {
    }
    %c0 = arith.constant 0 : index
    %c0_1 = arith.constant 0 : index
    %3 = vector.load %arg2[%c0, %c0_1] : memref<8x32xf32, #tpu.memory_space<vmem>>, vector<8x32xf32>
    %c0_2 = arith.constant 0 : index
    %c0_3 = arith.constant 0 : index
    %4 = vector.load %arg3[%c0_2, %c0_3] : memref<32x128xf32, #tpu.memory_space<vmem>>, vector<32x128xf32>
    %cst = arith.constant dense<0.000000e+00> : vector<8x128xf32>
    %5 = tpu.matmul %3, %4, %cst {dimension_numbers = #tpu.dot_dimension_numbers<[1], [0], [0], [1], [0, 0, 1, 1], [], []>} : vector<8x32xf32>, vector<32x128xf32>, vector<8x128xf32> -> vector<8x128xf32>
    %c0_4 = arith.constant 0 : index
    %c0_5 = arith.constant 0 : index
    %6 = vector.load %arg4[%c0_4, %c0_5] : memref<8x8xf32, #tpu.memory_space<vmem>>, vector<8x8xf32>
    %7 = vector.extract_strided_slice %6 {offsets = [0, 0], sizes = [8, 1], strides = [1, 1]} : vector<8x8xf32> to vector<8x1xf32>
    %8 = vector.extract_strided_slice %6 {offsets = [0, 1], sizes = [8, 1], strides = [1, 1]} : vector<8x8xf32> to vector<8x1xf32>
    %9 = vector.extract_strided_slice %6 {offsets = [0, 2], sizes = [8, 1], strides = [1, 1]} : vector<8x8xf32> to vector<8x1xf32>
    %10 = vector.broadcast %7 : vector<8x1xf32> to vector<8x128xf32>
    %11 = arith.mulf %5, %10 : vector<8x128xf32>
    %c0_6 = arith.constant 0 : index
    %c0_7 = arith.constant 0 : index
    %12 = vector.load %arg7[%c0_6, %c0_7] : memref<1x128xf32, #tpu.memory_space<vmem>>, vector<1x128xf32>
    %13 = vector.broadcast %12 : vector<1x128xf32> to vector<8x128xf32>
    %14 = arith.mulf %11, %13 : vector<8x128xf32>
    %cst_8 = arith.constant -1.000000e+00 : f32
    %cst_9 = arith.constant 1.000000e+00 : f32
    %15 = vector.broadcast %cst_8 : f32 to vector<8x128xf32>
    %16 = arith.maximumf %15, %14 : vector<8x128xf32>
    %17 = vector.broadcast %cst_9 : f32 to vector<8x128xf32>
    %18 = arith.minimumf %17, %16 : vector<8x128xf32>
    %19 = arith.mulf %18, %18 : vector<8x128xf32>
    %cst_10 = arith.constant 1.000000e+00 : f32
    %20 = vector.broadcast %cst_10 : f32 to vector<8x128xf32>
    %21 = arith.subf %20, %19 : vector<8x128xf32>
    %22 = math.sqrt %21 : vector<8x128xf32>
    %cst_11 = arith.constant 6.400000e+01 : f32
    %23 = vector.broadcast %cst_11 : f32 to vector<8x128xf32>
    %24 = arith.mulf %23, %18 : vector<8x128xf32>
    %25 = vector.broadcast %8 : vector<8x1xf32> to vector<8x128xf32>
    %26 = arith.mulf %18, %25 : vector<8x128xf32>
    %27 = vector.broadcast %9 : vector<8x1xf32> to vector<8x128xf32>
    %28 = arith.mulf %22, %27 : vector<8x128xf32>
    %29 = arith.subf %26, %28 : vector<8x128xf32>
    %cst_12 = arith.constant 0.000000e+00 : f32
    %30 = vector.broadcast %cst_12 : f32 to vector<8x128xf32>
    %31 = arith.cmpf ogt, %18, %30 : vector<8x128xf32>
    %32 = arith.select %31, %29, %24 : vector<8x128xi1>, vector<8x128xf32>
    %c0_13 = arith.constant 0 : index
    %c0_14 = arith.constant 0 : index
    %33 = vector.load %arg5[%c0_13, %c0_14] : memref<8x128xf32, #tpu.memory_space<vmem>>, vector<8x128xf32>
    tpu.vector_store %arg5[%c0_13, %c0_14], %24 {strides = array<i32>} : memref<8x128xf32, #tpu.memory_space<vmem>>, vector<8x128xf32>,
    %c0_15 = arith.constant 0 : index
    %c0_16 = arith.constant 0 : index
    %34 = vector.load %arg6[%c0_15, %c0_16] : memref<8x128xf32, #tpu.memory_space<vmem>>, vector<8x128xf32>
    tpu.vector_store %arg6[%c0_15, %c0_16], %32 {strides = array<i32>} : memref<8x128xf32, #tpu.memory_space<vmem>>, vector<8x128xf32>,
    return
  }
  func.func @transform_0(%arg0: i32, %arg1: i32) -> (i32, i32) {
    %c0_i32 = arith.constant 0 : i32
    %c0_i32_0 = arith.constant 0 : i32
    return %arg1, %c0_i32 : i32, i32
  }
  func.func @transform_1(%arg0: i32, %arg1: i32) -> (i32, i32) {
    %c0_i32 = arith.constant 0 : i32
    %c0_i32_0 = arith.constant 0 : i32
    return %c0_i32, %arg0 : i32, i32
  }
  func.func @transform_2(%arg0: i32, %arg1: i32) -> (i32, i32) {
    %c0_i32 = arith.constant 0 : i32
    %c0_i32_0 = arith.constant 0 : i32
    return %arg1, %c0_i32 : i32, i32
  }
  func.func @transform_3(%arg0: i32, %arg1: i32) -> (i32, i32) {
    %c0_i32 = arith.constant 0 : i32
    return %arg1, %arg0 : i32, i32
  }
  func.func @transform_4(%arg0: i32, %arg1: i32) -> (i32, i32) {
    %c0_i32 = arith.constant 0 : i32
    return %arg1, %arg0 : i32, i32
  }
}

</mosaic_0001>

<bundles_post_ra>
// kernel: tpu_custom_call.1
= control target key start
LH: loop header
LB: loop body
LE: loop exit
PB: predicated region body
PF: predicated region fallthrough
CT: control target
= control target key end

     0   :  { %s1291_s0 = inlined_call_operand.vmem [shape: f32[16,32], index: 0, kind: input, shape index: {}]   ;;  %s1292_s1 = inlined_call_operand.hbm [shape: f32[32,256], index: 1, kind: input, shape index: {}]   ;;  %s1293_s2 = inlined_call_operand.vmem [shape: f32[16,8], index: 2, kind: input, shape index: {}]   ;;  %s1294_s3 = inlined_call_operand.hbm [shape: f32[16,256], index: 3, kind: output, shape index: {0}]   ;;  %s1295_s4 = inlined_call_operand.hbm [shape: f32[16,256], index: 4, kind: output, shape index: {1}]  }
   0x1   :  { %1299 = sst [smem:[#allocation14_spill]] %s1292_s1 }
   0x2   :  { %10 = vsyncpa [#allocation4], 0 }
   0x3   :  { %12 = vsyncpa [#allocation4 + $0x1], 0 }
   0x4   :  { %13 = vsyncpa [#allocation5], 0 }
   0x5   :  { %15 = vsyncpa [#allocation5 + $0x1], 0 }
   0x6   :  { %16 = vsyncpa [#allocation8], 0 }
   0x7   :  { %18 = vsyncpa [#allocation8 + $0x1], 0  ;;  %s1001_s15 = smov 0   ;;  %s1003_s16 = smov 0  }
   0x8   :  { %s1005_s17 = smov 0   ;;  %s1007_s18 = smov 0  }
   0x9   :  { %s1009_s19 = smov 0   ;;  %s1011_s20 = smov 0  }
   0xa   :  { %s1013_s21 = smov 0   ;;  %s1015_s22 = smov 0  }
   0xb   :  { %s1017_s23 = smov 0   ;;  %s1019_s24 = smov 0  }
   0xc   :  { %s1021_s25 = smov 0  }
   0xd LB: > { %s606_s26 = sadd.s32 4294967295, %s962_s25   ;;  %s607_s27 = sadd.s32 4294967294, %s962_s25   ;;  %s962_s25 = sphi %s1021_s25, %s24_s25   ;;  %s958_s24 = sphi %s1019_s24, %s1321_s24   ;;  %s954_s23 = sphi %s1017_s23, %s1320_s23   ;;  %s950_s22 = sphi %s1015_s22, %s1319_s22   ;;  %s946_s21 = sphi %s1013_s21, %s1318_s21   ;;  %s942_s20 = sphi %s1011_s20, %s1317_s20   ;;  %s938_s19 = sphi %s1009_s19, %s1316_s19   ;;  %s934_s18 = sphi %s1007_s18, %s1315_s18   ;;  %s930_s17 = sphi %s1005_s17, %s1314_s17   ;;  %s926_s16 = sphi %s1003_s16, %s1313_s16   ;;  %s922_s15 = sphi %s1001_s15, %s1312_s15  }
   0xe   : > { %s33_s28 = sadd.s32 1, %s954_s23  ;;  %s36_s29 = sadd.s32 1, %s958_s24 }
   0xf   : > { %p34_p0 = scmp.ge.s32.totalorder %s33_s28, 2  ;;  %s69_s30 = sadd.s32 1, %s942_s20 }
  0x10   : > { %p76_p1 = scmp.ne.s32.totalorder %s942_s20, %s938_s19  ;;  %p77_p2 = scmp.eq.s32.totalorder %s962_s25, 0 }
  0x11   : > { %s1323_s28 = smov (%p34_p0, %s33_s28), 0  ;;  %s1325_s29 = smov (!%p34_p0, %s36_s29), %s958_s24 }
  0x12   : > { %1300 = sst [smem:[#allocation12_spill]] %s1323_s28  ;;  %p1065_p3 = por %p77_p2, %p76_p1 }
  0x13   : > { %p82_p4 = scmp.ne.s32.totalorder %s938_s19, %s934_s18  ;;  %p38_p5 = scmp.ge.s32.totalorder %s1325_s29, 2 }
  0x14   : > { %p83_p6 = scmp.eq.s32.totalorder %s606_s26, 0  ;;  %s118_s6 = ssub.s32 %s954_s23, %s1323_s28 }
  0x15   : > { %s123_s7 = sadd.s32 1, %s930_s17  ;;  %s1327_s29 = smov (%p38_p5, %s1325_s29), 0 }
  0x16   : > { %1302 = sst [smem:[#allocation13_spill]] %s1327_s29  ;;  %p1075_p7 = por %p83_p6, %p82_p4 }
  0x17   : > { %p133_p8 = scmp.ne.s32.totalorder %s930_s17, %s926_s16  ;;  %s66_s9 = ssub.s32 %s958_s24, %s1327_s29 }
  0x18   : > { %p134_p9 = scmp.eq.s32.totalorder %s606_s26, 3  ;;  %p67_p10 = scmp.eq.s32.totalorder %s66_s9, 0 }
  0x19   : > { %s120_s10 = sor.u32 %s118_s6, %s66_s9  ;;  %p139_p13 = scmp.ne.s32.totalorder %s926_s16, %s922_s15 }
  0x1a   : > { %p121_p11 = scmp.eq.s32.totalorder %s120_s10, 0  ;;  %p1083_p12 = por %p134_p9, %p133_p8 }
  0x1b   : > { %s1088_s12 = scalar_select %p67_p10, %s942_s20, %s69_s30  }
  0x1c   : > { %s1304_s11 = scalar_select %p1083_p12, 1, 0 }
  0x1d   : > { %s1091_s13 = scalar_select %p121_p11, %s930_s17, %s123_s7  }
  0x1e   : > { %p140_p0 = scmp.eq.s32.totalorder %s607_s27, 3  ;;  %p669_p1 = scmp.lt.s32.totalorder %s962_s25, 4 }
  0x1f   : > { %s195_s18 = sand.u32 1, %s942_s20   ;;  %s611_s6 = sshll.u32 %s958_s24, 7 }
  0x20   : > { %p1096_p2 = por %p140_p0, %p139_p13  ;;  %s610_s26 = sshll.u32 %s195_s18, 5 }
  0x21   : > { %s1306_s1 = sld [smem:[#allocation14_spill]]  ;;  %s199_s30 = scalar_lea.vmem [#allocation3], %s610_s26 }
  0x22   : > { %s1305_s14 = scalar_select %p1096_p2, 1, 0 }
  0x23   : > { %s205_s7 = sshll.u32 %s199_s30, 4  ;;  %p1111_p4 = pnand %p669_p1, %p1065_p3  ;;  %s1107_s7 = int_to_ptr.vmem [resolvable:$true] %s205_s7 }
  0x24   : > { %s1115_s28 = scalar_lea.sflag [#allocation4], %s195_s18 }
  0x25   : > { %p780_p6 = pneg %p1111_p4 }
  0x27   : > { %s1105_s29 = scalar_lea.hbm %s1306_s1, %s611_s6  ;;  %s783_s5 = scalar_lea.hbm %s1306_s1, 1024 }
  0x28   : > { %s778_s9 = scalar_lea.hbm %s1105_s29, 512  ;;  %p784_p3 = scmp.lt.u32.totalorder %s1105_s29, %s1306_s1 }
  0x29   : > { %p779_p5 = scmp.ne.s32.totalorder %s1105_s29, %s778_s9  ;;  %p785_p10 = scmp.lt.u32.totalorder %s783_s5, %s778_s9 }
  0x2a   : > { %p787_p13 = scmp.lt.u32.totalorder %s778_s9, %s1105_s29 }
  0x2b   : > { %p781_p8 = pnand %p780_p6, %p779_p5  ;;  %p786_p11 = por %p785_p10, %p784_p3 }
  0x2d   : > { %p782_p9 = pneg %p781_p8  ;;  %p788_p0 = por %p787_p13, %p786_p11 }
  0x2f   : > { %p789_p1 = pnand %p788_p0, %p782_p9 }
  0x31   : > { %792 = shalt.err (!%p789_p1)
}
  0x32   : > { %s793_s18 = scalar_lea.vmem %s1107_s7, 512  ;;  %s964_s26 = smov [#allocation3]  }
  0x33   : > { %p794_p5 = scmp.ne.s32.totalorder %s1107_s7, %s793_s18  ;;  %s798_s6 = sshll.u32 %s964_s26, 4  ;;  %s799_s6 = int_to_ptr.vmem [resolvable:$false] %s798_s6 }
  0x34   : > { %s800_s10 = scalar_lea.vmem %s799_s6, 1024  ;;  %p801_p12 = scmp.lt.s32.totalorder %s1107_s7, %s799_s6 }
  0x35   : > { %p796_p8 = pnand %p794_p5, %p780_p6  ;;  %p802_p3 = scmp.lt.s32.totalorder %s800_s10, %s793_s18 }
  0x37   : > { %p797_p2 = pneg %p796_p8  ;;  %p803_p10 = por %p802_p3, %p801_p12 }
  0x39   : > { %p804_p11 = pnand %p803_p10, %p797_p2 }
  0x3b   : > { %807 = shalt.err (!%p804_p11)
}
  0x3c   : > { %s965_s9 = smov 256   ;;  %s966_s5 = smov 128  }
  0x3d   : > { %s967_s30 = smov 8   ;;  %p612_p6 = scmp.ge.s32.totalorder %s962_s25, 1 }
  0x3e   : > { %661 = dma.hbm_to_vmem [thread:$0]  (!%p1111_p4), %s1105_s29, 512, %s1107_s7, %s1115_s28, %s965_s9, %s966_s5, %s967_s30  }
  0x3f   : > { %p220_p9 = scmp.lt.s32.totalorder %s962_s25, 5 }
  0x41   : > { %p221_p13 = pnand %p612_p6, %p220_p9 }
  0x42   : > { %s226_s18 = sand.u32 (!%p221_p13), 1, %s938_s19  }
  0x43   : > { %224 = sbr.rel (%p221_p13) target bundleno = 405 (0x195), region = 32  ;;  %s613_s26 = sshll.u32 (!%p221_p13), %s226_s18, 5 }
  0x44   : > { %s227_s6 = scalar_lea.sflag (!%p221_p13), [#allocation4], %s226_s18  ;;  %s1146_s10 = scalar_lea.vmem (!%p221_p13), [#allocation3], %s613_s26 }
  0x4a   : > { %909 = dma.done.wait (%p1075_p7), %s227_s6, 512  }
  0x4b   : > { %911 = vsyncadd (%p1075_p7), %s227_s6, 4294966784  ;;  %s1153_s28 = sand.u32 1, %s926_s16   ;;  %p268_p12 = scmp.lt.s32.totalorder %s946_s21, 1 }
  0x4c   : > { %s614_s29 = sshll.u32 %s1153_s28, 3  ;;  %p618_p7 = scmp.ne.s32.totalorder %s946_s21, 0 }
  0x4d   : > { %s269_s7 = scalar_select %p268_p12, %s946_s21, 1 }
  0x4e   : > { %s1168_s6 = scalar_lea.vmem [#allocation6], %s614_s29  ;;  %s1170_s1 = scalar_lea.vmem [#allocation7], %s614_s29  ;;  %v280_v0 = vld [vmem:[%s1146_s10] sm:$0xff] (!%p618_p7)  ;;  %v281_v1 = vld [vmem:[%s1146_s10 + $0x8] sm:$0xff] (!%p618_p7)  ;;  %v282_v2 = vld [vmem:[%s1146_s10 + $0x10] sm:$0xff] (!%p618_p7) }
  0x4f   : > { %s616_s27 = sshll.u32 %s269_s7, 3  ;;  %279 = sbr.rel (%p618_p7) target bundleno = 128 (0x80), region = 40  ;;  %v283_v3 = vld [vmem:[%s1146_s10 + $0x18] sm:$0xff] (!%p618_p7)  ;;  %v284_v4 = vmul.f32 (!%p618_p7), %v280_v0, %v280_v0  ;;  %v285_v5 = vmul.f32 (!%p618_p7), %v281_v1, %v281_v1  ;;  %v286_v6 = vmul.f32 (!%p618_p7), %v282_v2, %v282_v2 }
  0x50   : > { %s1161_s30 = scalar_lea.vmem %s1291_s0, %s616_s27  ;;  %s1166_s8 = scalar_lea.vmem %s1293_s2, %s616_s27  ;;  %v287_v7 = vmul.f32 (!%p618_p7), %v283_v3, %v283_v3 }
  0x51   : > { %v288_v8 = vadd.f32 (!%p618_p7), %v285_v5, %v284_v4 }
  0x53   : > { %v289_v9 = vadd.f32 (!%p618_p7), %v288_v8, %v286_v6 }
  0x55   : > { %v290_v10 = vadd.f32 (!%p618_p7), %v289_v9, %v287_v7 }
  0x57   : > { %v291_v11 = vrot.slane %v290_v10, 4 }
  0x59   : > { %v292_v12 = vadd.f32 %v291_v11, %v290_v10 }
  0x5b   : > { %v293_v13 = vrot.slane %v292_v12, 2 }
  0x5d   : > { %v294_v14 = vadd.f32 %v293_v13, %v292_v12 }
  0x5f   : > { %v295_v15 = vrot.slane %v294_v14, 1 }
  0x61   : > { %v296_v16 = vadd.f32 %v295_v15, %v294_v14 }
  0x63   : > { %768 = vrsqrt.f32 %v296_v16  ;;  %vm299_vm0 = vcmp.eq.f32.partialorder %v296_v16, inf  ;;  %v302_v18 = vand.u32 2147483648, %v296_v16  ;;  %vm301_vm1 = vcmp.eq.f32.partialorder %v296_v16, 0.0 }
  0x6d   : > { %v769_v17 = vpop.eup %768 }
  0x6e   : > { %v298_v19 = vmul.f32 %v769_v17, %v296_v16 }
  0x70   : > { %v300_v20 = vsel %vm299_vm0, %v296_v16, %v298_v19 }
  0x71   : > { %v303_v21 = vsel %vm301_vm1, %v302_v18, %v300_v20 }
  0x72   : > { %v304_v22 = vmax.f32 %v303_v21, 1e-12 }
  0x74   : > { %770 = vrcp.f32 %v304_v22 }
  0x7e   : > { %v771_v23 = vpop.eup %770 }
  0x7f   : > { %307 = vst [vmem:[#allocation2] sm:$0x1] %v771_v23 }
  0x80 PF: > { %v309_v24 = vld [vmem:[%s1146_s10] sm:$0xff]  ;;  %v310_v25 = vld [vmem:[%s1146_s10 + $0x8] sm:$0xff]  ;;  %v311_v26 = vld [vmem:[%s1146_s10 + $0x10] sm:$0xff]  ;;  %v968_v27 = vmov 0.0|0.0   ;;  %vm969_vm2 = vmmov 0   ;;  %v970_v30 = vmov 0.0  }
  0x81   : > { %646 = vmatprep.subr.bf16.mxu0 %v968_v27  ;;  %v647_v28 = vpack.c.bf16 %v310_v25, %v309_v24  ;;  %v312_v29 = vld [vmem:[%s1146_s10 + $0x18] sm:$0xff]  ;;  %643 = vmatprep.mubr.msk.f32.mxu0 %vm969_vm2, %v970_v30  ;;  %v971_v32 = vmov 0   ;;  %v972_v34 = vmov 2   ;;  %vm313_vm3 = vcmask 261120   ;;  %s624_s10 = sshll.u32 %s946_s21, 1  ;;  %s450_s27 = sshll.u32 %s1168_s6, 4  ;;  %s1196_s27 = int_to_ptr.vmem [resolvable:$true] %s450_s27 }
  0x82   : > { %v387_v31 = vld [vmem:[%s1166_s8] sm:$0xff]  ;;  %772 = vset.pattern.permute.xlu0 %v971_v32  ;;  %v650_v33 = vpack.c.bf16 %v312_v29, %v311_v26  ;;  %774 = vset.pattern.permute.xlu1 %v972_v34  ;;  %v973_v36 = vmov 1   ;;  %s1185_s29 = sadd.s32 %s950_s22, %s624_s10  ;;  %s430_s22 = scalar_lea.sflag [#allocation5], %s1153_s28 }
  0x83   : > { %648 = vmatpush3.bf16.msra.mxu0 %v647_v28  ;;  %390 = vperm.xlu0 %772, %v387_v31   ;;  %v308_v35 = vld [vmem:[%s1161_s30] sm:$0xff]  ;;  %s625_s7 = sshll.u32 %s1185_s29, 7  ;;  %s808_s30 = scalar_lea.vmem %s1196_s27, 128 }
  0x84   : > { %649 = vmatprep.subr.bf16.mxu0 %v968_v27  ;;  %420 = vperm.xlu1 %774, %v387_v31   ;;  %s1194_s21 = scalar_lea.hbm %s1294_s3, %s625_s7  ;;  %p809_p2 = scmp.ne.s32.totalorder %s1196_s27, %s808_s30 }
  0x85   : > { %p1308_p4 = scmp.ne.s32.totalorder %s1304_s11, 0  ;;  %s974_s18 = smov [#allocation6]  }
  0x86   : > { %v620_v39 = vld [vmem:[#allocation2] ss:$0 sm:$0xff]  ;;  %s812_s26 = sshll.u32 %s974_s18, 4  ;;  %s813_s26 = int_to_ptr.vmem [resolvable:$false] %s812_s26 }
  0x87   : > { %651 = vmatpush3.bf16.msra.mxu0 %v650_v33  ;;  %773 = vset.pattern.permute.xlu0 %v973_v36  ;;  %p810_p0 = pnand %p809_p2, %p1308_p4  ;;  %s814_s8 = scalar_lea.vmem %s813_s26, 256 }
  0x88   : > { %415 = vperm.xlu0 %773, %v387_v31   ;;  %p815_p5 = scmp.lt.s32.totalorder %s1196_s27, %s813_s26  ;;  %p816_p8 = scmp.lt.s32.totalorder %s814_s8, %s808_s30 }
  0x89   : > { %p811_p1 = pneg %p810_p0 }
  0x8a   : > { %644 = vmatmul.mubr.msk.f32.vlgmr.msra.gmra.mrb[0].mxu0 %vm313_vm3, %v308_v35  ;;  %p817_p3 = por %p816_p8, %p815_p5 }
  0x8c   : > { %775 = vset.pattern.permute.xlu0 %v972_v34  ;;  %p818_p10 = pnand %p817_p3, %p811_p1 }
 0x102   : > { %v391_v37 = vpop.permute.xlu0 %390 }
 0x15d   : > { %v383_v38 = vpop.f32.mrb[0].mxu0 }
 0x15e   : > { %v393_v40 = vmul.f32 %v391_v37, %v383_v38  ;;  %v645_v41 = vpop.f32.mrb[1].mxu0 }
 0x160   : > { %v401_v42 = vmul.f32 %v620_v39, %v393_v40 }
 0x162   : > { %v621_v43 = vclamps-f32 %v401_v42, 1.0 }
 0x164   : > { %v404_v44 = vmul.f32 %v621_v43, %v621_v43  ;;  %v413_v45 = vmul.f32 64.0, %v621_v43 }
 0x166   : > { %v405_v46 = vsub.f32 1.0, %v404_v44  ;;  %427 = vst [vmem:[%s1168_s6] sm:$0xff] %v413_v45 }
 0x167   : > { %821 = shalt.err (!%p818_p10)
}
 0x168   : > { %s822_s6 = scalar_lea.hbm %s1194_s21, 128  ;;  %s826_s5 = scalar_lea.hbm %s1294_s3, 512 }
 0x169   : > { %p823_p11 = scmp.ne.s32.totalorder %s1194_s21, %s822_s6  ;;  %p827_p13 = scmp.lt.u32.totalorder %s1194_s21, %s1294_s3 }
 0x16a   : > { %p828_p12 = scmp.lt.u32.totalorder %s826_s5, %s822_s6  ;;  %p830_p2 = scmp.lt.u32.totalorder %s822_s6, %s1194_s21 }
 0x16b   : > { %p824_p6 = pnand %p823_p11, %p1308_p4 }
 0x16c   : > { %p829_p7 = por %p828_p12, %p827_p13 }
 0x16d   : > { %p825_p9 = pneg %p824_p6 }
 0x16e   : > { %p831_p0 = por %p830_p2, %p829_p7 }
 0x170   : > { %p832_p1 = pnand %p831_p0, %p825_p9 }
 0x172   : > { %835 = shalt.err (!%p832_p1)
}
 0x173   : > { %654 = dma.vmem_to_hbm [thread:$0]  (%p1308_p4), %s1196_s27, 128, %s1194_s21, %s430_s22   ;;  %776 = vrsqrt.f32 %v405_v46  ;;  %v416_v49 = vpop.permute.xlu0 %415  ;;  %v421_v50 = vpop.permute.xlu1 %420  ;;  %vm408_vm4 = vcmp.eq.f32.partialorder %v405_v46, inf  ;;  %v411_v51 = vand.u32 2147483648, %v405_v46  ;;  %vm410_vm5 = vcmp.eq.f32.partialorder %v405_v46, 0.0 }
 0x174   : > { %v418_v54 = vmul.f32 %v621_v43, %v416_v49  ;;  %s465_s30 = sshll.u32 %s1170_s1, 4  ;;  %vm425_vm6 = vcmp.gt.f32.partialorder %v621_v43, 0.0  ;;  %s1227_s22 = scalar_lea.hbm %s1295_s4, %s625_s7  ;;  %s1229_s30 = int_to_ptr.vmem [resolvable:$true] %s465_s30 }
 0x175   : > { %s435_s8 = scalar_lea.sflag [#allocation8], %s1153_s28  ;;  %s836_s6 = scalar_lea.vmem %s1229_s30, 128 }
 0x176   : > { %p837_p5 = scmp.ne.s32.totalorder %s1229_s30, %s836_s6  ;;  %s975_s10 = smov [#allocation7]  }
 0x177   : > { %s840_s29 = sshll.u32 %s975_s10, 4  ;;  %s841_s29 = int_to_ptr.vmem [resolvable:$false] %s840_s29 }
 0x178   : > { %p838_p8 = pnand %p837_p5, %p1308_p4  ;;  %s842_s9 = scalar_lea.vmem %s841_s29, 256 }
 0x179   : > { %p843_p10 = scmp.lt.s32.totalorder %s1229_s30, %s841_s29  ;;  %p844_p11 = scmp.lt.s32.totalorder %s842_s9, %s836_s6 }
 0x17a   : > { %p839_p3 = pneg %p838_p8 }
 0x17b   : > { %p845_p6 = por %p844_p11, %p843_p10 }
 0x17d   : > { %v777_v47 = vpop.eup %776  ;;  %p846_p9 = pnand %p845_p6, %p839_p3 }
 0x17e   : > { %v407_v48 = vmul.f32 %v777_v47, %v405_v46 }
 0x180   : > { %v409_v52 = vsel %vm408_vm4, %v405_v46, %v407_v48 }
 0x181   : > { %v412_v53 = vsel %vm410_vm5, %v411_v51, %v409_v52 }
 0x182   : > { %v423_v55 = vmul.f32 %v421_v50, %v412_v53 }
 0x184   : > { %v424_v56 = vsub.f32 %v418_v54, %v423_v55 }
 0x186   : > { %v426_v57 = vsel %vm425_vm6, %v424_v56, %v413_v45 }
 0x187   : > { %428 = vst [vmem:[%s1170_s1] sm:$0xff] %v426_v57 }
 0x188   : > { %849 = shalt.err (!%p846_p9)
}
 0x189   : > { %s850_s1 = scalar_lea.hbm %s1227_s22, 128  ;;  %s854_s5 = scalar_lea.hbm %s1295_s4, 512 }
 0x18a   : > { %p851_p13 = scmp.ne.s32.totalorder %s1227_s22, %s850_s1  ;;  %p855_p2 = scmp.lt.u32.totalorder %s1227_s22, %s1295_s4 }
 0x18b   : > { %p856_p0 = scmp.lt.u32.totalorder %s854_s5, %s850_s1  ;;  %p858_p5 = scmp.lt.u32.totalorder %s850_s1, %s1227_s22 }
 0x18c   : > { %p852_p12 = pnand %p851_p13, %p1308_p4 }
 0x18d   : > { %p857_p1 = por %p856_p0, %p855_p2 }
 0x18e   : > { %p853_p7 = pneg %p852_p12 }
 0x18f   : > { %p859_p8 = por %p858_p5, %p857_p1 }
 0x191   : > { %p860_p3 = pnand %p859_p8, %p853_p7 }
 0x193   : > { %863 = shalt.err (!%p860_p3)
}
 0x194   : > { %655 = dma.vmem_to_hbm [thread:$0]  (%p1308_p4), %s1229_s30, 128, %s1227_s22, %s435_s8  }
 0x195 PF: > { %p670_p10 = scmp.ge.s32.totalorder %s962_s25, 2  ;;  %s477_s27 = sand.u32 1, %s922_s15  }
 0x196   : > { %p1309_p11 = scmp.ne.s32.totalorder %s1305_s14, 0  ;;  %s478_s21 = scalar_lea.sflag [#allocation5], %s477_s27 }
 0x198   : > { %p663_p6 = pnand %p670_p10, %p1309_p11 }
 0x19a   : > { %913 = dma.done.wait (!%p663_p6), %s478_s21, 128  }
 0x19b   : > { %915 = vsyncadd (!%p663_p6), %s478_s21, 4294967168  ;;  %s487_s6 = scalar_lea.sflag [#allocation8], %s477_s27 }
 0x19c   : > { %917 = dma.done.wait (!%p663_p6), %s487_s6, 128  }
 0x19d   : > { %919 = vsyncadd (!%p663_p6), %s487_s6, 4294967168  ;;  %s24_s25 = sadd.s32 1, %s962_s25   ;;  %s1310_s11 = sld [smem:[#allocation12_spill]] }
 0x19e   : > { %p21_p9 = scmp.ge.s32.totalorder %s24_s25, 6   ;;  %s1311_s14 = sld [smem:[#allocation13_spill]] }
 0x19f   : > { %s1312_s15 = smov %s926_s16  ;;  %s1313_s16 = smov %s930_s17 }
 0x1a0   : > { %s1314_s17 = smov %s1091_s13  ;;  %s1315_s18 = smov %s938_s19 }
 0x1a1   : > { %s1316_s19 = smov %s942_s20  ;;  %s1317_s20 = smov %s1088_s12 }
 0x1a2   : > { %s1318_s21 = smov %s954_s23  ;;  %s1319_s22 = smov %s958_s24 }
 0x1a3   : > { %s1320_s23 = smov %s1310_s11  ;;  %23 = sbr.rel (!%p21_p9) target bundleno = 13 (0xd), region = 104 }
 0x1a4   : > { %s1321_s24 = smov %s1311_s14 }
 0x1aa   :  { %492 = vsyncpa [#allocation4], 1 }
 0x1ab   :  { %494 = vsyncpa [#allocation4 + $0x1], 1 }
 0x1ac   :  { %495 = vsyncpa [#allocation5], 1 }
 0x1ad   :  { %497 = vsyncpa [#allocation5 + $0x1], 1 }
 0x1ae   :  { %498 = vsyncpa [#allocation8], 1 }
 0x1af   :  { %500 = vsyncpa [#allocation8 + $0x1], 1 }

</bundles_post_ra>
